<compile_context>
chip_gen: v7x
topology: tpu7x:2x2x1
jax: 0.10.0
libtpu: 0.0.40
codegen_flags: <defaults>
</compile_context>

<pallas_src>
import functools
from math import sqrt

import numpy as np
import jax
import jax.numpy as jnp
from jax.experimental import pallas as pl
from jax.experimental.pallas import tpu as pltpu


# ----------------------------- Kernel A ------------------------------------
# Per (b, q-tile): batched-over-heads Q @ K^T and the sparsity measure
#   M = max(QK, -1) - sum(QK, -1) / L_K     (scores never leave VMEM)
def _m_kernel(q_ref, k_ref, m_ref, *, inv_l_k):
    q = q_ref[...]                                   # (H, TQ, D)  input dtype
    k = k_ref[...]                                   # (H, L_K, D) input dtype
    s = jnp.einsum("hqd,hkd->hqk", q, k,
                   preferred_element_type=jnp.float32)   # (H, TQ, L_K) f32
    m_ref[...] = jnp.max(s, axis=-1) - jnp.sum(s, axis=-1) * inv_l_k


# ----------------------------- Kernel B ------------------------------------
# Per b: recompute s_top from the gathered top-u query rows, scaled softmax,
# attn @ V, then scatter into the mean-V initial context (exact 0/1 one-hot).
def _context_kernel(idx_ref, qt_ref, k_ref, v_ref, ctx_ref, *, scale, l_q):
    qt = qt_ref[...]                                 # (H, u, D)   input dtype
    k = k_ref[...]                                   # (H, L_K, D) input dtype
    v = v_ref[...]                                   # (H, L_K, D) input dtype
    idx = idx_ref[...]                               # (H, u) int32
    n_h, u, _ = qt.shape

    # s_top = q_top @ K^T  (tiny: u x D x L_K), f32 accumulation
    s = jnp.einsum("hud,hkd->huk", qt, k,
                   preferred_element_type=jnp.float32) * scale   # (H, u, L_K)
    s = s - jnp.max(s, axis=-1, keepdims=True)
    p = jnp.exp(s)                                                # EUP
    attn = p * pl.reciprocal(jnp.sum(p, axis=-1, keepdims=True), approx=True)

    out = jnp.einsum("huk,hkd->hud", attn.astype(v.dtype), v,
                     preferred_element_type=jnp.float32)          # (H, u, D)

    # initial context = mean of V over L_V (f32)
    v_mean = jnp.mean(v.astype(jnp.float32), axis=1, keepdims=True)  # (H,1,D)

    # exact scatter of the u attention rows into the mean-V context
    rows = jax.lax.broadcasted_iota(jnp.int32, (n_h, l_q, u), 1)
    onehot = (rows == idx[:, None, :]).astype(jnp.float32)        # (H, L_Q, u)
    scattered = jnp.einsum("hlu,hud->hld",
                           onehot.astype(v.dtype), out.astype(v.dtype),
                           preferred_element_type=jnp.float32)    # (H, L_Q, D)
    selected = jnp.sum(onehot, axis=-1, keepdims=True)            # (H, L_Q, 1)
    ctx_ref[...] = (scattered + (1.0 - selected) * v_mean).astype(ctx_ref.dtype)


# ------------------------------ Wrapper ------------------------------------
def sparse_attention(queries, keys, values, attn_mask=None, *,
                     factor=5, scale=None):
    """SparseAttention.forward with mask_flag=False, output_attention=False.

    queries/keys/values: (B, L, H, D) in the PyTorch forward() layout.
    Returns (context (B, H, L_Q, D), None), matching the PyTorch module.
    """
    del attn_mask  # unused when mask_flag=False
    B, L_Q, H, D = queries.shape
    _, L_K, _, _ = keys.shape

    # heads-major layout, keep the input dtype (bf16 inputs -> bf16 MXU path)
    q = jnp.transpose(queries, (0, 2, 1, 3))          # (B, H, L_Q, D)
    k = jnp.transpose(keys, (0, 2, 1, 3))             # (B, H, L_K, D)
    v = jnp.transpose(values, (0, 2, 1, 3))           # (B, H, L_K, D)

    u = int(factor * np.ceil(np.log(L_Q)).astype("int").item())
    u = u if u < L_Q else L_Q
    scale_val = float(scale) if scale is not None else 1.0 / sqrt(D)

    # --- kernel A: sparsity measure M only, lane-dense (B, H, L_Q) ----------
    tq = min(L_Q, 128)                     # q-row tile (full L_Q for small L)
    n_q_tiles = pl.cdiv(L_Q, tq)
    m = pl.pallas_call(
        functools.partial(_m_kernel, inv_l_k=1.0 / L_K),
        grid=(B, n_q_tiles),
        in_specs=[
            pl.BlockSpec((None, H, tq, D), lambda b, i: (b, 0, i, 0)),
            pl.BlockSpec((None, H, L_K, D), lambda b, i: (b, 0, 0, 0)),
        ],
        out_specs=pl.BlockSpec((None, H, tq), lambda b, i: (b, 0, i)),
        out_shape=jax.ShapeDtypeStruct((B, H, L_Q), jnp.float32),
        compiler_params=pltpu.CompilerParams(
            dimension_semantics=("parallel", "parallel")),
    )(q, k)

    # top-u query selection + row gather stay in plain JAX
    # TODO(synk): sort/top_k has no Mosaic lowering; only the index pick and
    # the tiny (B,H,u,D) row gather run in XLA.
    _, index = jax.lax.top_k(m, u)                         # (B, H, u) int32
    index = index.astype(jnp.int32)
    q_top = jnp.take_along_axis(q, index[..., None], axis=2)   # (B, H, u, D)

    # --- kernel B: recompute s_top, softmax, attn @ V, scatter into mean-V --
    context = pl.pallas_call(
        functools.partial(_context_kernel, scale=scale_val, l_q=L_Q),
        grid=(B,),
        in_specs=[
            pl.BlockSpec((None, H, u), lambda b: (b, 0, 0)),
            pl.BlockSpec((None, H, u, D), lambda b: (b, 0, 0, 0)),
            pl.BlockSpec((None, H, L_K, D), lambda b: (b, 0, 0, 0)),
            pl.BlockSpec((None, H, L_K, D), lambda b: (b, 0, 0, 0)),
        ],
        out_specs=pl.BlockSpec((None, H, L_Q, D), lambda b: (b, 0, 0, 0)),
        out_shape=jax.ShapeDtypeStruct((B, H, L_Q, D), values.dtype),
        compiler_params=pltpu.CompilerParams(
            dimension_semantics=("parallel",)),
    )(index, q_top, k, v)

    # output_attention=False -> attn is None (dropout is never applied in the
    # PyTorch forward either)
    return context, None


# --------------------------- Pure-JAX reference -----------------------------
def _reference(queries, keys, values, factor=5, scale=None):
    B, L_Q, H, D = queries.shape
    q = jnp.transpose(queries, (0, 2, 1, 3)).astype(jnp.float32)
    k = jnp.transpose(keys, (0, 2, 1, 3)).astype(jnp.float32)
    v = jnp.transpose(values, (0, 2, 1, 3)).astype(jnp.float32)
    L_K = k.shape[2]
    u = min(int(factor * np.ceil(np.log(L_Q))), L_Q)
    qk = jnp.einsum("bhqd,bhkd->bhqk", q, k)
    M = qk.max(-1) - qk.sum(-1) / L_K
    _, idx = jax.lax.top_k(M, u)
    q_red = jnp.take_along_axis(q, idx[..., None], axis=2)
    s_top = jnp.einsum("bhud,bhkd->bhuk", q_red, k) * (scale or 1.0 / sqrt(D))
    attn = jax.nn.softmax(s_top, axis=-1)
    out = jnp.einsum("bhuk,bhkd->bhud", attn, v)
    ctx = jnp.broadcast_to(v.mean(axis=2, keepdims=True), (B, H, L_Q, D))
    b_idx = jnp.arange(B)[:, None, None]
    h_idx = jnp.arange(H)[None, :, None]
    return ctx.at[b_idx, h_idx, idx, :].set(out)


if __name__ == "__main__":
    B, L, H, D = 2, 16, 4, 32          # L_Q = L_K = 16, u = 5*ceil(log 16) = 15
    key = jax.random.PRNGKey(0)
    kq, kk, kv = jax.random.split(key, 3)
    # bf16 inputs: matmuls run on the bf16 MXU path; accumulation stays f32,
    # so the top-k selection matches the f32 reference.
    queries = jax.random.normal(kq, (B, L, H, D), jnp.float32).astype(jnp.bfloat16)
    keys_ = jax.random.normal(kk, (B, L, H, D), jnp.float32).astype(jnp.bfloat16)
    values = jax.random.normal(kv, (B, L, H, D), jnp.float32).astype(jnp.bfloat16)

    context, attn = sparse_attention(queries, keys_, values, None)
    context = jax.block_until_ready(context)

    ref = _reference(queries, keys_, values)
    np.testing.assert_allclose(np.asarray(context, dtype=np.float32),
                               np.asarray(ref, dtype=np.float32),
                               rtol=3e-2, atol=3e-2)
    assert context.shape == (B, H, L, D) and attn is None
    print("KERNEL_OK")
</pallas_src>

<mosaic_0001>
module attributes {stable_mosaic.version = 11 : i64} {
  func.func @_m_kernel(%arg0: i32, %arg1: i32, %arg2: memref<1x4x16x32xbf16, #tpu.memory_space<vmem>>, %arg3: memref<1x4x16x32xbf16, #tpu.memory_space<vmem>>, %arg4: memref<1x4x16xf32, #tpu.memory_space<vmem>>) attributes {dimension_semantics = [#tpu.dimension_semantics<parallel>, #tpu.dimension_semantics<parallel>], iteration_bounds = array<i64: 2, 1>, scalar_prefetch = 0 : i64, scratch_operands = 0 : i64, tpu.core_type = #tpu.core_type<tc>, window_params = [{transform_indices = @transform_0, window_bounds = array<i64: 1, 4, 16, 32>}, {transform_indices = @transform_1, window_bounds = array<i64: 1, 4, 16, 32>}, {transform_indices = @transform_2, window_bounds = array<i64: 1, 4, 16>}]} {
    %c0 = arith.constant 0 : index
    %c0_0 = arith.constant 0 : index
    %c0_1 = arith.constant 0 : index
    %c0_2 = arith.constant 0 : index
    %0 = vector.load %arg2[%c0, %c0_0, %c0_1, %c0_2] : memref<1x4x16x32xbf16, #tpu.memory_space<vmem>>, vector<1x4x16x32xbf16>
    %1 = vector.shape_cast %0 : vector<1x4x16x32xbf16> to vector<4x16x32xbf16>
    %c0_3 = arith.constant 0 : index
    %c0_4 = arith.constant 0 : index
    %c0_5 = arith.constant 0 : index
    %c0_6 = arith.constant 0 : index
    %2 = vector.load %arg3[%c0_3, %c0_4, %c0_5, %c0_6] : memref<1x4x16x32xbf16, #tpu.memory_space<vmem>>, vector<1x4x16x32xbf16>
    %3 = vector.shape_cast %2 : vector<1x4x16x32xbf16> to vector<4x16x32xbf16>
    "tpu.trace_start"() <{level = 10 : i32, message = "hqd,hkd->hqk"}> : () -> ()
    %cst = arith.constant dense<0.000000e+00> : vector<4x16x16xf32>
    %4 = tpu.matmul %1, %3, %cst {dimension_numbers = #tpu.dot_dimension_numbers<[2], [2], [1], [1], [0, 0, 0, 1, 1, 1], [0], [0]>} : vector<4x16x32xbf16>, vector<4x16x32xbf16>, vector<4x16x16xf32> -> vector<4x16x16xf32>
    "tpu.trace_stop"() : () -> ()
    %cst_7 = arith.constant dense<0xFF800000> : vector<4x16xf32>
    %5 = vector.multi_reduction <maximumf>, %4, %cst_7 [2] : vector<4x16x16xf32> to vector<4x16xf32>
    %cst_8 = arith.constant dense<0.000000e+00> : vector<4x16xf32>
    %6 = vector.multi_reduction <add>, %4, %cst_8 [2] : vector<4x16x16xf32> to vector<4x16xf32>
    %cst_9 = arith.constant 6.250000e-02 : f32
    %7 = vector.broadcast %cst_9 : f32 to vector<4x16xf32>
    %8 = arith.mulf %6, %7 : vector<4x16xf32>
    %9 = arith.subf %5, %8 : vector<4x16xf32>
    %c0_10 = arith.constant 0 : index
    %c0_11 = arith.constant 0 : index
    %c0_12 = arith.constant 0 : index
    %10 = vector.load %arg4[%c0_10, %c0_11, %c0_12] : memref<1x4x16xf32, #tpu.memory_space<vmem>>, vector<1x4x16xf32>
    %11 = vector.shape_cast %10 : vector<1x4x16xf32> to vector<4x16xf32>
    %12 = vector.shape_cast %9 : vector<4x16xf32> to vector<1x4x16xf32>
    tpu.vector_store %arg4[%c0_10, %c0_11, %c0_12], %12 {strides = array<i32>} : memref<1x4x16xf32, #tpu.memory_space<vmem>>, vector<1x4x16xf32>,
    return
  }
  func.func @transform_0(%arg0: i32, %arg1: i32) -> (i32, i32, i32, i32) {
    %c0_i32 = arith.constant 0 : i32
    %c0_i32_0 = arith.constant 0 : i32
    %c0_i32_1 = arith.constant 0 : i32
    return %arg0, %c0_i32, %arg1, %c0_i32_0 : i32, i32, i32, i32
  }
  func.func @transform_1(%arg0: i32, %arg1: i32) -> (i32, i32, i32, i32) {
    %c0_i32 = arith.constant 0 : i32
    %c0_i32_0 = arith.constant 0 : i32
    %c0_i32_1 = arith.constant 0 : i32
    %c0_i32_2 = arith.constant 0 : i32
    return %arg0, %c0_i32, %c0_i32_0, %c0_i32_1 : i32, i32, i32, i32
  }
  func.func @transform_2(%arg0: i32, %arg1: i32) -> (i32, i32, i32) {
    %c0_i32 = arith.constant 0 : i32
    %c0_i32_0 = arith.constant 0 : i32
    return %arg0, %c0_i32, %arg1 : i32, i32, i32
  }
}

</mosaic_0001>

<bundles_post_ra>
// kernel: tpu_custom_call.1
= control target key start
LH: loop header
LB: loop body
LE: loop exit
PB: predicated region body
PF: predicated region fallthrough
CT: control target
= control target key end

     0   :  { %7 = vsyncpa [#allocation3], 0  ;;  %s1295_s0 = inlined_call_operand.hbm [shape: bf16[2,4,16,32], index: 0, kind: input, shape index: {}]   ;;  %s1296_s1 = inlined_call_operand.hbm [shape: bf16[2,4,16,32], index: 1, kind: input, shape index: {}]   ;;  %s1297_s2 = inlined_call_operand.hbm [shape: f32[2,4,16], index: 2, kind: output, shape index: {}]  }
   0x1   :  { %9 = vsyncpa [#allocation3 + $0x1], 0 }
   0x2   :  { %10 = vsyncpa [#allocation6], 0 }
   0x3   :  { %12 = vsyncpa [#allocation6 + $0x1], 0 }
   0x4   :  { %13 = vsyncpa [#allocation4], 0 }
   0x5   :  { %15 = vsyncpa [#allocation4 + $0x1], 0  ;;  %s1022_s9 = smov 0   ;;  %s1024_s10 = smov 0  }
   0x6   :  { %s1026_s11 = smov 0   ;;  %s1028_s12 = smov 0  }
   0x7   :  { %s1030_s13 = smov 0   ;;  %s1032_s14 = smov 0  }
   0x8 LB: > { %s709_s15 = sadd.s32 4294967295, %s998_s14   ;;  %s710_s16 = sadd.s32 4294967294, %s998_s14   ;;  %s998_s14 = sphi %s1032_s14, %s21_s14   ;;  %s994_s13 = sphi %s1030_s13, %s1315_s13   ;;  %s990_s12 = sphi %s1028_s12, %s1314_s12   ;;  %s986_s11 = sphi %s1026_s11, %s1313_s11   ;;  %s982_s10 = sphi %s1024_s10, %s1312_s10   ;;  %s978_s9 = sphi %s1022_s9, %s1311_s9  }
   0x9   : > { %s33_s17 = sadd.s32 1, %s994_s13  ;;  %s42_s18 = sadd.s32 1, %s986_s11 }
   0xa   : > { %p35_p0 = scmp.ge.s32.totalorder %s33_s17, 2  ;;  %p49_p1 = scmp.ne.s32.totalorder %s986_s11, %s982_s10 }
   0xb   : > { %p50_p2 = scmp.eq.s32.totalorder %s998_s14, 0  ;;  %p55_p3 = scmp.ne.s32.totalorder %s982_s10, %s978_s9 }
   0xc   : > { %s1317_s17 = smov (%p35_p0, %s33_s17), 0  ;;  %p56_p5 = scmp.eq.s32.totalorder %s709_s15, 0 }
   0xd   : > { %p1063_p4 = por %p50_p2, %p49_p1  ;;  %s37_s20 = ssub.s32 %s994_s13, %s1317_s17 }
   0xe   : > { %p107_p6 = scmp.eq.s32.totalorder %s709_s15, 1  ;;  %p40_p7 = scmp.eq.s32.totalorder %s37_s20, 0 }
   0xf   : > { %p1069_p8 = por %p56_p5, %p55_p3  ;;  %p113_p10 = scmp.eq.s32.totalorder %s710_s16, 1 }
  0x10   : > { %p1073_p9 = por %p107_p6, %p49_p1  ;;  %p790_p13 = scmp.lt.s32.totalorder %s998_s14, 2 }
  0x11   : > { %s1301_s21 = scalar_select %p1069_p8, 1, 0 }
  0x12   : > { %s1302_s22 = scalar_select %p1073_p9, 1, 0 }
  0x13   : > { %s1078_s23 = scalar_select %p40_p7, %s986_s11, %s42_s18  }
  0x14   : > { %p1080_p11 = por %p113_p10, %p55_p3  ;;  %s1087_s25 = sand.u32 1, %s986_s11  }
  0x15   : > { %s713_s26 = sshll.u32 %s1087_s25, 5  ;;  %s739_s27 = sshll.u32 %s994_s13, 9 }
  0x16   : > { %s1303_s24 = scalar_select %p1080_p11, 1, 0 }
  0x17   : > { %s1096_s30 = scalar_lea.hbm %s1295_s0, %s739_s27  ;;  %s137_s3 = scalar_lea.vmem [#allocation2], %s713_s26 }
  0x18   : > { %s146_s4 = sshll.u32 %s137_s3, 4  ;;  %p1104_p0 = pnand %p790_p13, %p1063_p4  ;;  %s1100_s4 = int_to_ptr.vmem [resolvable:$true] %s146_s4 }
  0x19   : > { %s134_s6 = scalar_lea.sflag [#allocation3], %s1087_s25  ;;  %s852_s7 = scalar_lea.hbm %s1096_s30, 512 }
  0x1a   : > { %p853_p2 = scmp.ne.s32.totalorder %s1096_s30, %s852_s7  ;;  %p854_p3 = pneg %p1104_p0 }
  0x1b   : > { %s857_s16 = scalar_lea.hbm %s1295_s0, 1024  ;;  %p858_p4 = scmp.lt.u32.totalorder %s1096_s30, %s1295_s0 }
  0x1c   : > { %p855_p5 = pnand %p854_p3, %p853_p2  ;;  %p859_p7 = scmp.lt.u32.totalorder %s857_s16, %s852_s7 }
  0x1d   : > { %p861_p13 = scmp.lt.u32.totalorder %s852_s7, %s1096_s30 }
  0x1e   : > { %p856_p6 = pneg %p855_p5  ;;  %p860_p10 = por %p859_p7, %p858_p4 }
  0x20   : > { %p862_p12 = por %p861_p13, %p860_p10 }
  0x22   : > { %p863_p1 = pnand %p862_p12, %p856_p6 }
  0x24   : > { %866 = shalt.err (!%p863_p1)
}
  0x25   : > { %s867_s20 = scalar_lea.vmem %s1100_s4, 512  ;;  %s1000_s28 = smov [#allocation2]  }
  0x26   : > { %p868_p2 = scmp.ne.s32.totalorder %s1100_s4, %s867_s20  ;;  %s872_s29 = sshll.u32 %s1000_s28, 4  ;;  %s873_s29 = int_to_ptr.vmem [resolvable:$false] %s872_s29 }
  0x27   : > { %s874_s3 = scalar_lea.vmem %s873_s29, 1024  ;;  %p875_p9 = scmp.lt.s32.totalorder %s1100_s4, %s873_s29 }
  0x28   : > { %p870_p5 = pnand %p868_p2, %p854_p3  ;;  %p876_p4 = scmp.lt.s32.totalorder %s874_s3, %s867_s20 }
  0x2a   : > { %p871_p11 = pneg %p870_p5  ;;  %p877_p7 = por %p876_p4, %p875_p9 }
  0x2c   : > { %p878_p10 = pnand %p877_p7, %p871_p11 }
  0x2e   : > { %881 = shalt.err (!%p878_p10)
}
  0x2f   : > { %s1001_s7 = smov 64   ;;  %s1002_s8 = smov 4  }
  0x30   : > { %782 = dma.hbm_to_vmem [thread:$0]  (!%p1104_p0), %s1096_s30, 512, %s1100_s4, %s134_s6, %s1001_s7, %s1001_s7, %s1002_s8  }
  0x31   : > { %p175_p9 = scmp.lt.s32.totalorder %s998_s14, 3  ;;  %s1146_s18 = scalar_lea.hbm %s1296_s1, %s739_s27 }
  0x32   : > { %p1305_p11 = scmp.ge.s32.totalorder %s998_s14, 1  ;;  %s160_s20 = scalar_lea.vmem [#allocation5], %s713_s26 }
  0x33   : > { %s167_s28 = sshll.u32 %s160_s20, 4  ;;  %s157_s30 = scalar_lea.sflag [#allocation6], %s1087_s25  ;;  %s1156_s28 = int_to_ptr.vmem [resolvable:$true] %s167_s28 }
  0x34   : > { %p1150_p12 = pnand %p1305_p11, %p175_p9  ;;  %s882_s4 = scalar_lea.hbm %s1146_s18, 512 }
  0x35   : > { %p883_p1 = scmp.ne.s32.totalorder %s1146_s18, %s882_s4  ;;  %s887_s29 = scalar_lea.hbm %s1296_s1, 1024 }
  0x36   : > { %p888_p2 = scmp.lt.u32.totalorder %s1146_s18, %s1296_s1  ;;  %p889_p5 = scmp.lt.u32.totalorder %s887_s29, %s882_s4 }
  0x37   : > { %p885_p6 = pnand %p883_p1, %p854_p3  ;;  %p891_p7 = scmp.lt.u32.totalorder %s882_s4, %s1146_s18 }
  0x38   : > { %p890_p4 = por %p889_p5, %p888_p2 }
  0x39   : > { %p886_p13 = pneg %p885_p6 }
  0x3a   : > { %p892_p10 = por %p891_p7, %p890_p4 }
  0x3c   : > { %p893_p9 = pnand %p892_p10, %p886_p13 }
  0x3e   : > { %896 = shalt.err (!%p893_p9)
}
  0x3f   : > { %s897_s26 = scalar_lea.vmem %s1156_s28, 512  ;;  %s1003_s16 = smov [#allocation5]  }
  0x40   : > { %p898_p11 = scmp.ne.s32.totalorder %s1156_s28, %s897_s26  ;;  %s902_s20 = sshll.u32 %s1003_s16, 4  ;;  %s903_s20 = int_to_ptr.vmem [resolvable:$false] %s902_s20 }
  0x41   : > { %s904_s27 = scalar_lea.vmem %s903_s20, 1024  ;;  %p905_p8 = scmp.lt.s32.totalorder %s1156_s28, %s903_s20 }
  0x42   : > { %p900_p1 = pnand %p898_p11, %p854_p3  ;;  %p906_p2 = scmp.lt.s32.totalorder %s904_s27, %s897_s26 }
  0x44   : > { %p901_p6 = pneg %p900_p1  ;;  %p907_p5 = por %p906_p2, %p905_p8 }
  0x46   : > { %p908_p4 = pnand %p907_p5, %p901_p6 }
  0x48   : > { %911 = shalt.err (!%p908_p4)
}
  0x49   : > { %785 = dma.hbm_to_vmem [thread:$0]  (!%p1104_p0), %s1146_s18, 512, %s1156_s28, %s157_s30, %s1001_s7, %s1001_s7, %s1002_s8  }
  0x4a   : > { %179 = sbr.rel (%p1150_p12) target bundleno = 497 (0x1f1), region = 28  ;;  %s1190_s4 = sand.u32 (!%p1150_p12), 1, %s982_s10  }
  0x4b   : > { %s720_s6 = sshll.u32 (!%p1150_p12), %s1190_s4, 5  ;;  %s182_s29 = scalar_lea.sflag (!%p1150_p12), [#allocation3], %s1190_s4 }
  0x4c   : > { %s1194_s5 = scalar_lea.vmem (!%p1150_p12), [#allocation2], %s720_s6  ;;  %p1307_p8 = scmp.ne.s32.totalorder (!%p1150_p12), %s1301_s21, 0 }
  0x51   : > { %965 = dma.done.wait (%p1307_p8), %s182_s29, 512  }
  0x52   : > { %967 = vsyncadd (%p1307_p8), %s182_s29, 4294966784  ;;  %s191_s25 = scalar_lea.sflag [#allocation6], %s1190_s4  ;;  %s194_s7 = scalar_lea.vmem [#allocation5], %s720_s6 }
  0x53   : > { %969 = dma.done.wait (%p1307_p8), %s191_s25, 512  }
  0x54   : > { %971 = vsyncadd (%p1307_p8), %s191_s25, 4294966784  ;;  %v1004_v0 = vmov 0.0   ;;  %vm1005_vm0 = vmmov 0   ;;  %vm248_vm1 = vcmask 261120   ;;  %v844_v1 = vld [vmem:[%s194_s7] sm:$0xff]   ;;  %v845_v2 = vld [vmem:[%s194_s7 + $0x8] sm:$0xff]   ;;  %v540_v52 = vlaneseq }
  0x55   : > { %749 = vmatprep.subr.bf16.mxu0 %v1004_v0  ;;  %755 = vmatprep.subr.bf16.mxu1 %v1004_v0  ;;  %v253_v3 = vsel %vm248_vm1, %v844_v1, 0  ;;  %v310_v4 = vsel %vm248_vm1, %v845_v2, 0  ;;  %v848_v5 = vld [vmem:[%s194_s7 + $0x10] sm:$0xff]   ;;  %v849_v6 = vld [vmem:[%s194_s7 + $0x18] sm:$0xff]   ;;  %v846_v7 = vld [vmem:[%s1194_s5] sm:$0xff]   ;;  %vm467_vm2 = vcmask 130048  }
  0x56   : > { %751 = vmatprep.mubr.msk.bf16.mxu0 %vm1005_vm0, %v1004_v0  ;;  %757 = vmatprep.mubr.msk.bf16.mxu1 %vm1005_vm0, %v1004_v0  ;;  %v847_v8 = vld [vmem:[%s1194_s5 + $0x8] sm:$0xff]   ;;  %v367_v9 = vsel %vm248_vm1, %v848_v5, 0  ;;  %v424_v10 = vsel %vm248_vm1, %v849_v6, 0  ;;  %v850_v11 = vld [vmem:[%s1194_s5 + $0x10] sm:$0xff]   ;;  %v851_v12 = vld [vmem:[%s1194_s5 + $0x18] sm:$0xff]   ;;  %v541_v55 = vand.u32 127, %v540_v52 }
  0x57   : > { %750 = vmatpush3.bf16.xpose.msra.mxu0 %v253_v3  ;;  %756 = vmatpush3.bf16.xpose.msra.mxu1 %v310_v4  ;;  %v543_v58 = vshrl.u32 %v540_v52, 7  ;;  %s722_s21 = sshll.u32 %s1190_s4, 2  ;;  %vm551_vm3 = vcmask 130112   ;;  %vm580_vm4 = vcmask 1041409   ;;  %vm582_vm5 = vcmask 1042434   ;;  %s736_s8 = sshll.u32 %s990_s12, 6 }
  0x58   : > { %761 = vmatprep.subr.bf16.mxu0 %v1004_v0  ;;  %767 = vmatprep.subr.bf16.mxu1 %v1004_v0  ;;  %v546_v59 = vadd.s32 4294967288, %v541_v55  ;;  %s219_s18 = scalar_lea.vmem [#allocation7], %s722_s21  ;;  %vm584_vm6 = vcmask 1043459   ;;  %vm587_vm7 = vcmask 125952   ;;  %s1246_s3 = scalar_lea.hbm %s1297_s2, %s736_s8 }
  0x59   : > { %v544_v1 = vsub.s32 %v541_v55, %v543_v58  ;;  %s604_s19 = sshll.u32 %s219_s18, 4  ;;  %s590_s12 = scalar_lea.sflag [#allocation4], %s1190_s4  ;;  %s1248_s19 = int_to_ptr.vmem [resolvable:$true] %s604_s19 }
  0x5a   : > { %v549_v2 = vsub.s32 %v546_v59, %v543_v58  ;;  %s912_s15 = scalar_lea.vmem %s1248_s19, 64  ;;  %p1308_p3 = scmp.ne.s32.totalorder %s1302_s22, 0 }
  0x5b   : > { %p913_p0 = scmp.ne.s32.totalorder %s1248_s19, %s912_s15  ;;  %s1006_s26 = smov [#allocation7]  }
  0x5c   : > { %s916_s16 = sshll.u32 %s1006_s26, 4  ;;  %s917_s16 = int_to_ptr.vmem [resolvable:$false] %s916_s16 }
  0x5d   : > { %p914_p12 = pnand %p913_p0, %p1308_p3  ;;  %s918_s20 = scalar_lea.vmem %s917_s16, 128 }
  0x5e   : > { %752 = vmatmul.mubr.msk.bf16.vlgmr.msra.gmra.mrb[0].mxu0 %vm248_vm1, %v846_v7  ;;  %758 = vmatmul.mubr.msk.bf16.vlgmr.msra.gmra.mrb[0].mxu1 %vm248_vm1, %v847_v8  ;;  %p919_p7 = scmp.lt.s32.totalorder %s1248_s19, %s917_s16  ;;  %p920_p10 = scmp.lt.s32.totalorder %s918_s20, %s912_s15 }
  0x5f   : > { %762 = vmatpush3.bf16.xpose.msra.mxu0 %v367_v9  ;;  %768 = vmatpush3.bf16.xpose.msra.mxu1 %v424_v10  ;;  %p915_p13 = pneg %p914_p12 }
  0x60   : > { %763 = vmatprep.mubr.msk.bf16.mxu0 %vm1005_vm0, %v1004_v0  ;;  %769 = vmatprep.mubr.msk.bf16.mxu1 %vm1005_vm0, %v1004_v0  ;;  %p921_p9 = por %p920_p10, %p919_p7 }
  0x62   : > { %p922_p11 = pnand %p921_p9, %p915_p13 }
  0x66   : > { %764 = vmatmul.mubr.msk.bf16.vlgmr.msra.gmra.mrb[4].mxu0 %vm248_vm1, %v850_v11  ;;  %770 = vmatmul.mubr.msk.bf16.vlgmr.msra.gmra.mrb[4].mxu1 %vm248_vm1, %v851_v12 }
 0x131   : > { %v289_v13 = vpop.f32.mrb[0].mxu0  ;;  %v346_v14 = vpop.f32.mrb[0].mxu1 }
 0x132   : > { %v753_v15 = vpop.f32.mrb[1].mxu0  ;;  %v492_v16 = vsel %vm467_vm2, %v289_v13, 0.0  ;;  %v759_v17 = vpop.f32.mrb[1].mxu1  ;;  %v498_v18 = vsel %vm467_vm2, %v346_v14, 0.0  ;;  %v468_v23 = vsel %vm467_vm2, %v289_v13, -inf  ;;  %v474_v26 = vsel %vm467_vm2, %v346_v14, -inf }
 0x133   : > { %493 = vadd.xlane.f32.xlu0 %v492_v16  ;;  %v292_v19 = vpop.f32.mrb[2].mxu0  ;;  %499 = vadd.xlane.f32.xlu1 %v498_v18  ;;  %v349_v20 = vpop.f32.mrb[2].mxu1 }
 0x134   : > { %v754_v21 = vpop.f32.mrb[3].mxu0  ;;  %v760_v22 = vpop.f32.mrb[3].mxu1  ;;  %v501_v24 = vsel %vm467_vm2, %v349_v20, 0.0  ;;  %v471_v29 = vsel %vm467_vm2, %v292_v19, -inf  ;;  %v495_v35 = vsel %vm467_vm2, %v292_v19, 0.0  ;;  %v477_v36 = vsel %vm467_vm2, %v349_v20, -inf }
 0x137   : > { %469 = vmax.xlane.f32.xlu0 %v468_v23  ;;  %502 = vadd.xlane.f32.xlu1 %v501_v24 }
 0x139   : > { %v403_v25 = vpop.f32.mrb[4].mxu0  ;;  %v460_v28 = vpop.f32.mrb[4].mxu1 }
 0x13a   : > { %v765_v27 = vpop.f32.mrb[5].mxu0  ;;  %v771_v31 = vpop.f32.mrb[5].mxu1  ;;  %v504_v37 = vsel %vm467_vm2, %v403_v25, 0.0  ;;  %v510_v39 = vsel %vm467_vm2, %v460_v28, 0.0  ;;  %v480_v41 = vsel %vm467_vm2, %v403_v25, -inf  ;;  %v486_v43 = vsel %vm467_vm2, %v460_v28, -inf }
 0x13b   : > { %475 = vmax.xlane.f32.xlu0 %v474_v26  ;;  %v406_v30 = vpop.f32.mrb[6].mxu0  ;;  %472 = vmax.xlane.f32.xlu1 %v471_v29  ;;  %v463_v33 = vpop.f32.mrb[6].mxu1 }
 0x13c   : > { %v766_v32 = vpop.f32.mrb[7].mxu0  ;;  %v772_v34 = vpop.f32.mrb[7].mxu1  ;;  %v507_v38 = vsel %vm467_vm2, %v406_v30, 0.0  ;;  %v513_v40 = vsel %vm467_vm2, %v463_v33, 0.0  ;;  %v483_v42 = vsel %vm467_vm2, %v406_v30, -inf  ;;  %v489_v44 = vsel %vm467_vm2, %v463_v33, -inf }
 0x13f   : > { %496 = vadd.xlane.f32.xlu0 %v495_v35  ;;  %478 = vmax.xlane.f32.xlu1 %v477_v36 }
 0x143   : > { %505 = vadd.xlane.f32.xlu0 %v504_v37  ;;  %508 = vadd.xlane.f32.xlu1 %v507_v38 }
 0x147   : > { %511 = vadd.xlane.f32.xlu0 %v510_v39  ;;  %514 = vadd.xlane.f32.xlu1 %v513_v40 }
 0x14b   : > { %481 = vmax.xlane.f32.xlu0 %v480_v41  ;;  %484 = vmax.xlane.f32.xlu1 %v483_v42 }
 0x14f   : > { %487 = vmax.xlane.f32.xlu0 %v486_v43  ;;  %490 = vmax.xlane.f32.xlu1 %v489_v44 }
 0x1c0   : > { %v494_v45 = vpop.xlane.xlu0 %493  ;;  %v500_v46 = vpop.xlane.xlu1 %499 }
 0x1c1   : > { %v516_v62 = vmul.f32 0.0625, %v494_v45  ;;  %v518_v4 = vmul.f32 0.0625, %v500_v46 }
 0x1c4   : > { %v470_v47 = vpop.xlane.xlu0 %469  ;;  %v503_v48 = vpop.xlane.xlu1 %502 }
 0x1c5   : > { %v519_v63 = vmul.f32 0.0625, %v503_v48  ;;  %v524_v5 = vsub.f32 %v470_v47, %v516_v62 }
 0x1c7   : > { %v545_v16 = vrot.slane %v524_v5, %v544_v1 }
 0x1c8   : > { %v476_v49 = vpop.xlane.xlu0 %475  ;;  %v473_v50 = vpop.xlane.xlu1 %472 }
 0x1c9   : > { %v526_v11 = vsub.f32 %v476_v49, %v518_v4 }
 0x1cb   : > { %v556_v23 = vrot.slane %v526_v11, %v544_v1 }
 0x1cc   : > { %v497_v51 = vpop.xlane.xlu0 %496  ;;  %v479_v53 = vpop.xlane.xlu1 %478 }
 0x1cd   : > { %v517_v57 = vmul.f32 0.0625, %v497_v51  ;;  %v527_v6 = vsub.f32 %v479_v53, %v519_v63 }
 0x1cf   : > { %v525_v0 = vsub.f32 %v473_v50, %v517_v57  ;;  %v560_v17 = vrot.slane %v527_v6, %v549_v2 }
 0x1d0   : > { %v506_v54 = vpop.xlane.xlu0 %505  ;;  %v509_v56 = vpop.xlane.xlu1 %508 }
 0x1d1   : > { %v520_v3 = vmul.f32 0.0625, %v506_v54  ;;  %v521_v7 = vmul.f32 0.0625, %v509_v56  ;;  %v550_v12 = vrot.slane %v525_v0, %v549_v2  ;;  %v561_v28 = vsel %vm551_vm3, %v560_v17, %v556_v23 }
 0x1d3   : > { %v552_v24 = vsel %vm551_vm3, %v550_v12, %v545_v16 }
 0x1d4   : > { %v512_v60 = vpop.xlane.xlu0 %511  ;;  %v515_v61 = vpop.xlane.xlu1 %514  ;;  %v581_v30 = vsel %vm580_vm4, %v561_v28, %v552_v24 }
 0x1d5   : > { %v522_v14 = vmul.f32 0.0625, %v512_v60  ;;  %v523_v18 = vmul.f32 0.0625, %v515_v61 }
 0x1d8   : > { %v482_v8 = vpop.xlane.xlu0 %481  ;;  %v485_v10 = vpop.xlane.xlu1 %484 }
 0x1d9   : > { %v528_v9 = vsub.f32 %v482_v8, %v520_v3  ;;  %v529_v13 = vsub.f32 %v485_v10, %v521_v7 }
 0x1db   : > { %v565_v15 = vrot.slane %v528_v9, %v544_v1  ;;  %v569_v19 = vrot.slane %v529_v13, %v549_v2 }
 0x1dc   : > { %v488_v20 = vpop.xlane.xlu0 %487  ;;  %v491_v22 = vpop.xlane.xlu1 %490 }
 0x1dd   : > { %v530_v21 = vsub.f32 %v488_v20, %v522_v14  ;;  %v531_v25 = vsub.f32 %v491_v22, %v523_v18  ;;  %v570_v26 = vsel %vm551_vm3, %v569_v19, %v565_v15 }
 0x1de   : > { %v583_v31 = vsel %vm582_vm5, %v570_v26, %v581_v30 }
 0x1df   : > { %v574_v27 = vrot.slane %v530_v21, %v544_v1  ;;  %v578_v29 = vrot.slane %v531_v25, %v549_v2 }
 0x1e1   : > { %v579_v32 = vsel %vm551_vm3, %v578_v29, %v574_v27 }
 0x1e2   : > { %v585_v33 = vsel %vm584_vm6, %v579_v32, %v583_v31 }
 0x1e3   : > { %588 = vst.msk [vmem:[%s219_s18] sm:$0xf] %vm587_vm7, %v585_v33 }
 0x1e4   : > { %925 = shalt.err (!%p922_p11)
}
 0x1e5   : > { %s926_s27 = scalar_lea.hbm %s1246_s3, 64  ;;  %s930_s29 = scalar_lea.hbm %s1297_s2, 128 }
 0x1e6   : > { %p927_p1 = scmp.ne.s32.totalorder %s1246_s3, %s926_s27  ;;  %p931_p5 = scmp.lt.u32.totalorder %s1246_s3, %s1297_s2 }
 0x1e7   : > { %p932_p4 = scmp.lt.u32.totalorder %s930_s29, %s926_s27  ;;  %p934_p0 = scmp.lt.u32.totalorder %s926_s27, %s1246_s3 }
 0x1e8   : > { %p928_p6 = pnand %p927_p1, %p1308_p3 }
 0x1e9   : > { %p933_p8 = por %p932_p4, %p931_p5 }
 0x1ea   : > { %p929_p2 = pneg %p928_p6 }
 0x1eb   : > { %p935_p12 = por %p934_p0, %p933_p8 }
 0x1ed   : > { %p936_p13 = pnand %p935_p12, %p929_p2 }
 0x1ef   : > { %939 = shalt.err (!%p936_p13)
}
 0x1f0   : > { %777 = dma.vmem_to_hbm [thread:$0]  (%p1308_p3), %s1248_s19, 64, %s1246_s3, %s590_s12  }
 0x1f1 PF: > { %s616_s7 = sand.u32 1, %s978_s9   ;;  %p1309_p7 = scmp.ne.s32.totalorder %s1303_s24, 0 }
 0x1f2   : > { %p1310_p10 = scmp.ge.s32.totalorder %s998_s14, 2  ;;  %s617_s21 = scalar_lea.sflag [#allocation4], %s616_s7 }
 0x1f4   : > { %p787_p9 = pnand %p1310_p10, %p1309_p7 }
 0x1f6   : > { %973 = dma.done.wait (!%p787_p9), %s617_s21, 64  }
 0x1f7   : > { %975 = vsyncadd (!%p787_p9), %s617_s21, 4294967232  ;;  %s21_s14 = sadd.s32 1, %s998_s14   ;;  %s1311_s9 = smov %s982_s10 }
 0x1f8   : > { %p18_p11 = scmp.ge.s32.totalorder %s21_s14, 4   ;;  %s1312_s10 = smov %s986_s11 }
 0x1f9   : > { %s1313_s11 = smov %s1078_s23  ;;  %s1314_s12 = smov %s994_s13 }
 0x1fa   : > { %s1315_s13 = smov %s1317_s17  ;;  %20 = sbr.rel (!%p18_p11) target bundleno = 8 (0x8), region = 86 }
 0x201   :  { %622 = vsyncpa [#allocation3], 1 }
 0x202   :  { %624 = vsyncpa [#allocation3 + $0x1], 1 }
 0x203   :  { %625 = vsyncpa [#allocation6], 1 }
 0x204   :  { %627 = vsyncpa [#allocation6 + $0x1], 1 }
 0x205   :  { %628 = vsyncpa [#allocation4], 1 }
 0x206   :  { %630 = vsyncpa [#allocation4 + $0x1], 1 }

</bundles_post_ra>
